<compile_context>
chip_gen: v5e
topology: v5e:2x2
jax: 0.10.0
libtpu: 0.0.40
codegen_flags: <defaults>
</compile_context>

<pallas_src>
import jax
import jax.numpy as jnp
from jax import lax
from jax.experimental import pallas as pl
from jax.experimental.pallas import tpu as pltpu


def _sa1_kernel(xh_ref, xo_ref, wqk_ref, wv_ref, bv_ref, xr_ref, attn_ref):
    x_h = xh_ref[...]                     # (C, N)  current batch element
    x_o = xo_ref[...]                     # (C, M)
    wqk = wqk_ref[...]                    # (C4, C) shared q/k weight
    wv = wv_ref[...]                      # (C, C)
    bv = bv_ref[...]                      # (C, 1)

    # --- Projections: native (default-precision) MXU path. -----------------
    q_t = jnp.dot(wqk, x_h, preferred_element_type=jnp.float32)       # (C4, N)
    k = jnp.dot(wqk, x_o, preferred_element_type=jnp.float32)         # (C4, M)
    v = jnp.dot(wv, x_o, preferred_element_type=jnp.float32) + bv     # (C, M)

    # --- alpha^T = k^T @ q as a canonical (M,C4)x(C4,N) MXU matmul. --------
    # Explicit tiny transpose of k avoids a sublane-contracted dot_general
    # (hidden relayout on the matmul path at scale).  HIGHEST is scoped to
    # this dot only: alpha feeds the sign-free, cancellation-sensitive
    # normalization denominator.
    k_t = jnp.transpose(k)                                             # (M, C4)
    alpha_t = jnp.dot(k_t, q_t, preferred_element_type=jnp.float32,
                      precision=lax.Precision.HIGHEST)                 # (M, N)

    # PyTorch normalizes over dim=1 (the N axis) -> lane-axis (-1) sum here.
    denom = 1e-9 + jnp.sum(alpha_t, axis=-1, keepdims=True)           # (M, 1)
    attn_t = alpha_t * (1.0 / denom)                                   # (M, N)

    # --- x_r = v (C,M) @ attn^T (M,N): canonical MXU matmul. ---------------
    xr_ref[...] = jnp.dot(v, attn_t,
                          preferred_element_type=jnp.float32).astype(xr_ref.dtype)

    # Emit attention directly in the PyTorch (N, M) layout.  The transpose
    # runs on the otherwise-idle XLU, so no wrapper HBM round-trip is needed.
    attn_ref[...] = jnp.transpose(attn_t).astype(attn_ref.dtype)


def grasp_transformer_last(x_h, x_o, w_qk, w_v, b_v):
    """x_h: (B, C, N), x_o: (B, C, M), w_qk: (C//4, C), w_v: (C, C), b_v: (C,).
    Returns (x_r (B, C, N), attn (B, N, M)) exactly like SA_Layer_1.forward."""
    B, C, N = x_h.shape
    _, _, M = x_o.shape
    C4 = w_qk.shape[0]

    x_h = x_h.astype(jnp.float32)
    x_o = x_o.astype(jnp.float32)
    w_qk = w_qk.astype(jnp.float32)
    w_v = w_v.astype(jnp.float32)
    b_v2 = b_v.reshape(C, 1).astype(jnp.float32)

    # Advisory cost estimate so XLA schedules around the custom call sensibly.
    flops = int(B * 2 * (C4 * C * N + C4 * C * M + C * C * M + M * C4 * N + C * M * N))
    bytes_accessed = int(4 * (B * C * N + B * C * M + C4 * C + C * C + C
                              + B * C * N + B * N * M))

    grid_spec = pltpu.PrefetchScalarGridSpec(
        num_scalar_prefetch=0,
        grid=(B,),
        in_specs=[
            pl.BlockSpec((pl.Squeezed(), C, N), lambda b: (b, 0, 0)),   # x_h
            pl.BlockSpec((pl.Squeezed(), C, M), lambda b: (b, 0, 0)),   # x_o
            pl.BlockSpec((C4, C), lambda b: (0, 0)),                    # Wqk (shared q/k)
            pl.BlockSpec((C, C), lambda b: (0, 0)),                     # Wv
            pl.BlockSpec((C, 1), lambda b: (0, 0)),                     # bv
        ],
        out_specs=[
            pl.BlockSpec((pl.Squeezed(), C, N), lambda b: (b, 0, 0)),   # x_r
            pl.BlockSpec((pl.Squeezed(), N, M), lambda b: (b, 0, 0)),   # attn (PyTorch layout)
        ],
    )

    x_r, attn = pl.pallas_call(
        _sa1_kernel,
        out_shape=(
            jax.ShapeDtypeStruct((B, C, N), jnp.float32),
            jax.ShapeDtypeStruct((B, N, M), jnp.float32),
        ),
        grid_spec=grid_spec,
        compiler_params=pltpu.CompilerParams(
            dimension_semantics=("parallel",)),     # batch across TCs (v7x: 2 cores)
        cost_estimate=pl.CostEstimate(flops=flops, transcendentals=0,
                                      bytes_accessed=bytes_accessed),
    )(x_h, x_o, w_qk, w_v, b_v2)

    return x_r, attn


def _reference(x_h, x_o, w_qk, w_v, b_v):
    # Pure-JAX reference of SA_Layer_1.forward, mirroring the kernel's
    # precision choices (default MXU path everywhere, HIGHEST on the alpha dot).
    q = jnp.einsum("qc,bcn->bnq", w_qk, x_h)                              # (B, N, C4)
    k = jnp.einsum("qc,bcm->bqm", w_qk, x_o)                              # (B, C4, M)
    v = jnp.einsum("dc,bcm->bmd", w_v, x_o) + b_v[None, None, :]          # (B, M, C)
    alpha = jnp.einsum("bnq,bqm->bnm", q, k,
                       precision=lax.Precision.HIGHEST)                   # (B, N, M)
    attn = alpha / (1e-9 + jnp.sum(alpha, axis=1, keepdims=True))
    x_r = jnp.einsum("bnm,bmd->bnd", attn, v)                             # (B, N, C)
    return jnp.transpose(x_r, (0, 2, 1)), attn                            # (B, C, N), (B, N, M)


if __name__ == "__main__":
    B, C, N, M = 2, 32, 16, 16
    C4 = C // 4

    key = jax.random.PRNGKey(0)
    k1, k2, k3, k4, k5 = jax.random.split(key, 5)

    # Well-conditioned test inputs: positive activations and positive q/k
    # weights keep the raw (un-exponentiated) sum-over-N denominator bounded
    # away from zero, so the comparison is numerically meaningful.
    x_h = jax.random.uniform(k1, (B, C, N), dtype=jnp.float32, minval=0.5, maxval=1.5)
    x_o = jax.random.uniform(k2, (B, C, M), dtype=jnp.float32, minval=0.5, maxval=1.5)
    w_qk = jax.random.uniform(k3, (C4, C), dtype=jnp.float32, minval=0.02, maxval=0.10)
    w_v = jax.random.uniform(k4, (C, C), dtype=jnp.float32, minval=-0.05, maxval=0.05)
    b_v = jax.random.uniform(k5, (C,), dtype=jnp.float32, minval=-0.01, maxval=0.01)

    x_r, attn = grasp_transformer_last(x_h, x_o, w_qk, w_v, b_v)
    jax.block_until_ready((x_r, attn))

    x_r_ref, attn_ref = _reference(x_h, x_o, w_qk, w_v, b_v)
    assert x_r.shape == (B, C, N) and attn.shape == (B, N, M)

    # Tolerances: the attention tile is normalized (values ~1/N) and matches
    # tightly; x_r gets a slightly looser absolute tolerance because the
    # default-precision (bf16-pass) MXU matmuls in kernel vs. XLA reference may
    # round/accumulate differently.
    assert jnp.allclose(attn, attn_ref, rtol=1e-3, atol=1e-3), \
        float(jnp.max(jnp.abs(attn - attn_ref)))
    assert jnp.allclose(x_r, x_r_ref, rtol=3e-3, atol=3e-3), \
        float(jnp.max(jnp.abs(x_r - x_r_ref)))

    print("KERNEL_OK")
</pallas_src>

<mosaic_0001>
module attributes {stable_mosaic.version = 11 : i64} {
  func.func @_sa1_kernel(%arg0: i32, %arg1: memref<1x32x16xf32, #tpu.memory_space<vmem>>, %arg2: memref<1x32x16xf32, #tpu.memory_space<vmem>>, %arg3: memref<8x32xf32, #tpu.memory_space<vmem>>, %arg4: memref<32x32xf32, #tpu.memory_space<vmem>>, %arg5: memref<32x1xf32, #tpu.memory_space<vmem>>, %arg6: memref<1x32x16xf32, #tpu.memory_space<vmem>>, %arg7: memref<1x16x16xf32, #tpu.memory_space<vmem>>) attributes {dimension_semantics = [#tpu.dimension_semantics<parallel>], iteration_bounds = array<i64: 2>, scalar_prefetch = 0 : i64, scratch_operands = 0 : i64, tpu.core_type = #tpu.core_type<tc>, window_params = [{transform_indices = @transform_0, window_bounds = array<i64: 1, 32, 16>}, {transform_indices = @transform_1, window_bounds = array<i64: 1, 32, 16>}, {pipeline_mode = #tpu.pipeline_mode<synchronous>, transform_indices = @transform_2, window_bounds = array<i64: 8, 32>}, {pipeline_mode = #tpu.pipeline_mode<synchronous>, transform_indices = @transform_3, window_bounds = array<i64: 32, 32>}, {pipeline_mode = #tpu.pipeline_mode<synchronous>, transform_indices = @transform_4, window_bounds = array<i64: 32, 1>}, {transform_indices = @transform_5, window_bounds = array<i64: 1, 32, 16>}, {transform_indices = @transform_6, window_bounds = array<i64: 1, 16, 16>}]} {
    %c0 = arith.constant 0 : index
    %c0_0 = arith.constant 0 : index
    %c0_1 = arith.constant 0 : index
    %0 = vector.load %arg1[%c0, %c0_0, %c0_1] : memref<1x32x16xf32, #tpu.memory_space<vmem>>, vector<1x32x16xf32>
    %1 = vector.shape_cast %0 : vector<1x32x16xf32> to vector<32x16xf32>
    %c0_2 = arith.constant 0 : index
    %c0_3 = arith.constant 0 : index
    %c0_4 = arith.constant 0 : index
    %2 = vector.load %arg2[%c0_2, %c0_3, %c0_4] : memref<1x32x16xf32, #tpu.memory_space<vmem>>, vector<1x32x16xf32>
    %3 = vector.shape_cast %2 : vector<1x32x16xf32> to vector<32x16xf32>
    %c0_5 = arith.constant 0 : index
    %c0_6 = arith.constant 0 : index
    %4 = vector.load %arg3[%c0_5, %c0_6] : memref<8x32xf32, #tpu.memory_space<vmem>>, vector<8x32xf32>
    %c0_7 = arith.constant 0 : index
    %c0_8 = arith.constant 0 : index
    %5 = vector.load %arg4[%c0_7, %c0_8] : memref<32x32xf32, #tpu.memory_space<vmem>>, vector<32x32xf32>
    %c0_9 = arith.constant 0 : index
    %c0_10 = arith.constant 0 : index
    %6 = vector.load %arg5[%c0_9, %c0_10] : memref<32x1xf32, #tpu.memory_space<vmem>>, vector<32x1xf32>
    %cst = arith.constant dense<0.000000e+00> : vector<8x16xf32>
    %7 = tpu.matmul %4, %1, %cst {dimension_numbers = #tpu.dot_dimension_numbers<[1], [0], [0], [1], [0, 0, 1, 1], [], []>} : vector<8x32xf32>, vector<32x16xf32>, vector<8x16xf32> -> vector<8x16xf32>
    %cst_11 = arith.constant dense<0.000000e+00> : vector<8x16xf32>
    %8 = tpu.matmul %4, %3, %cst_11 {dimension_numbers = #tpu.dot_dimension_numbers<[1], [0], [0], [1], [0, 0, 1, 1], [], []>} : vector<8x32xf32>, vector<32x16xf32>, vector<8x16xf32> -> vector<8x16xf32>
    %cst_12 = arith.constant dense<0.000000e+00> : vector<32x16xf32>
    %9 = tpu.matmul %5, %3, %cst_12 {dimension_numbers = #tpu.dot_dimension_numbers<[1], [0], [0], [1], [0, 0, 1, 1], [], []>} : vector<32x32xf32>, vector<32x16xf32>, vector<32x16xf32> -> vector<32x16xf32>
    %10 = vector.broadcast %6 : vector<32x1xf32> to vector<32x16xf32>
    %11 = arith.addf %9, %10 : vector<32x16xf32>
    %12 = tpu.transpose %8, [1, 0] : vector<8x16xf32> -> vector<16x8xf32>
    %cst_13 = arith.constant dense<0.000000e+00> : vector<16x16xf32>
    %13 = tpu.matmul %12, %7, %cst_13 {dimension_numbers = #tpu.dot_dimension_numbers<[1], [0], [0], [1], [0, 0, 1, 1], [], []>, precision = #tpu.contract_precision<fp32>} : vector<16x8xf32>, vector<8x16xf32>, vector<16x16xf32> -> vector<16x16xf32>
    %cst_14 = arith.constant dense<0.000000e+00> : vector<16xf32>
    %14 = vector.multi_reduction <add>, %13, %cst_14 [1] : vector<16x16xf32> to vector<16xf32>
    %15 = vector.shape_cast %14 : vector<16xf32> to vector<16x1xf32>
    %cst_15 = arith.constant 9.99999971E-10 : f32
    %16 = vector.broadcast %cst_15 : f32 to vector<16x1xf32>
    %17 = arith.addf %16, %15 : vector<16x1xf32>
    %cst_16 = arith.constant 1.000000e+00 : f32
    %18 = vector.broadcast %cst_16 : f32 to vector<16x1xf32>
    %19 = arith.divf %18, %17 : vector<16x1xf32>
    %20 = vector.broadcast %19 : vector<16x1xf32> to vector<16x16xf32>
    %21 = arith.mulf %13, %20 : vector<16x16xf32>
    %cst_17 = arith.constant dense<0.000000e+00> : vector<32x16xf32>
    %22 = tpu.matmul %11, %21, %cst_17 {dimension_numbers = #tpu.dot_dimension_numbers<[1], [0], [0], [1], [0, 0, 1, 1], [], []>} : vector<32x16xf32>, vector<16x16xf32>, vector<32x16xf32> -> vector<32x16xf32>
    %c0_18 = arith.constant 0 : index
    %c0_19 = arith.constant 0 : index
    %c0_20 = arith.constant 0 : index
    %23 = vector.load %arg6[%c0_18, %c0_19, %c0_20] : memref<1x32x16xf32, #tpu.memory_space<vmem>>, vector<1x32x16xf32>
    %24 = vector.shape_cast %23 : vector<1x32x16xf32> to vector<32x16xf32>
    %25 = vector.shape_cast %22 : vector<32x16xf32> to vector<1x32x16xf32>
    tpu.vector_store %arg6[%c0_18, %c0_19, %c0_20], %25 {strides = array<i32>} : memref<1x32x16xf32, #tpu.memory_space<vmem>>, vector<1x32x16xf32>,
    %26 = tpu.transpose %21, [1, 0] : vector<16x16xf32> -> vector<16x16xf32>
    %c0_21 = arith.constant 0 : index
    %c0_22 = arith.constant 0 : index
    %c0_23 = arith.constant 0 : index
    %27 = vector.load %arg7[%c0_21, %c0_22, %c0_23] : memref<1x16x16xf32, #tpu.memory_space<vmem>>, vector<1x16x16xf32>
    %28 = vector.shape_cast %27 : vector<1x16x16xf32> to vector<16x16xf32>
    %29 = vector.shape_cast %26 : vector<16x16xf32> to vector<1x16x16xf32>
    tpu.vector_store %arg7[%c0_21, %c0_22, %c0_23], %29 {strides = array<i32>} : memref<1x16x16xf32, #tpu.memory_space<vmem>>, vector<1x16x16xf32>,
    return
  }
  func.func @transform_0(%arg0: i32) -> (i32, i32, i32) {
    %c0_i32 = arith.constant 0 : i32
    %c0_i32_0 = arith.constant 0 : i32
    %c0_i32_1 = arith.constant 0 : i32
    return %arg0, %c0_i32, %c0_i32_0 : i32, i32, i32
  }
  func.func @transform_1(%arg0: i32) -> (i32, i32, i32) {
    %c0_i32 = arith.constant 0 : i32
    %c0_i32_0 = arith.constant 0 : i32
    %c0_i32_1 = arith.constant 0 : i32
    return %arg0, %c0_i32, %c0_i32_0 : i32, i32, i32
  }
  func.func @transform_2(%arg0: i32) -> (i32, i32) {
    %c0_i32 = arith.constant 0 : i32
    %c0_i32_0 = arith.constant 0 : i32
    %c0_i32_1 = arith.constant 0 : i32
    return %c0_i32, %c0_i32_0 : i32, i32
  }
  func.func @transform_3(%arg0: i32) -> (i32, i32) {
    %c0_i32 = arith.constant 0 : i32
    %c0_i32_0 = arith.constant 0 : i32
    %c0_i32_1 = arith.constant 0 : i32
    return %c0_i32, %c0_i32_0 : i32, i32
  }
  func.func @transform_4(%arg0: i32) -> (i32, i32) {
    %c0_i32 = arith.constant 0 : i32
    %c0_i32_0 = arith.constant 0 : i32
    %c0_i32_1 = arith.constant 0 : i32
    return %c0_i32, %c0_i32_0 : i32, i32
  }
  func.func @transform_5(%arg0: i32) -> (i32, i32, i32) {
    %c0_i32 = arith.constant 0 : i32
    %c0_i32_0 = arith.constant 0 : i32
    %c0_i32_1 = arith.constant 0 : i32
    return %arg0, %c0_i32, %c0_i32_0 : i32, i32, i32
  }
  func.func @transform_6(%arg0: i32) -> (i32, i32, i32) {
    %c0_i32 = arith.constant 0 : i32
    %c0_i32_0 = arith.constant 0 : i32
    %c0_i32_1 = arith.constant 0 : i32
    return %arg0, %c0_i32, %c0_i32_0 : i32, i32, i32
  }
}

</mosaic_0001>

<bundles_post_ra>
// kernel: tpu_custom_call.1
= control target key start
LH: loop header
LB: loop body
LE: loop exit
PB: predicated region body
PF: predicated region fallthrough
CT: control target
= control target key end

     0   :  { %12 = vsyncpa [#allocation3], 0  ;;  %s1205_s0 = inlined_call_operand.vmem [shape: f32[2,32,16], index: 0, kind: input, shape index: {}]   ;;  %s1206_s1 = inlined_call_operand.vmem [shape: f32[2,32,16], index: 1, kind: input, shape index: {}]   ;;  %s1207_s2 = inlined_call_operand.vmem [shape: f32[8,32], index: 2, kind: input, shape index: {}]   ;;  %s1208_s3 = inlined_call_operand.vmem [shape: f32[32,32], index: 3, kind: input, shape index: {}]   ;;  %s1209_s4 = inlined_call_operand.vmem [shape: f32[32,1], index: 4, kind: input, shape index: {}]   ;;  %s1210_s5 = inlined_call_operand.vmem [shape: f32[2,32,16], index: 5, kind: output, shape index: {0}]   ;;  %s1211_s6 = inlined_call_operand.hbm [shape: f32[2,16,16], index: 6, kind: output, shape index: {1}]  }
   0x1   :  { %14 = vsyncpa [#allocation3 + $0x1], 0  ;;  %s1046_s21 = smov 0   ;;  %s1048_s22 = smov 0  }
   0x2   :  { %s1050_s23 = smov 0   ;;  %s1052_s24 = smov 0  }
   0x3 LB: > { %s1067_s25 = sadd.s32 4294967295, %s1006_s24   ;;  %s864_s26 = sadd.s32 4294967294, %s1006_s24   ;;  %s1006_s24 = sphi %s1052_s24, %s1217_s24   ;;  %s1002_s23 = sphi %s1050_s23, %s1216_s23   ;;  %s998_s22 = sphi %s1048_s22, %s1215_s22   ;;  %s994_s21 = sphi %s1046_s21, %s1214_s21  }
   0x4   : > { %s1071_s27 = sadd.s32 1, %s1006_s24   ;;  %s168_s28 = sadd.s32 1, %s1002_s23 }
   0x5   : > { %s165_s29 = ssub.s32 %s1006_s24, %s1071_s27  ;;  %p178_p0 = scmp.ne.s32.totalorder %s1002_s23, %s998_s22 }
   0x6   : > { %p166_p1 = scmp.eq.s32.totalorder %s165_s29, 0  ;;  %p179_p2 = scmp.eq.s32.totalorder %s1067_s25, 1 }
   0x7   : > { %p184_p3 = scmp.ne.s32.totalorder %s998_s22, %s994_s21  ;;  %p185_p4 = scmp.eq.s32.totalorder %s864_s26, 1 }
   0x8   : > { %s1082_s30 = scalar_select %p166_p1, %s1002_s23, %s168_s28  }
   0x9   : > { %p1084_p5 = por %p179_p2, %p178_p0  ;;  %p1088_p6 = por %p185_p4, %p184_p3 }
   0xa   : > { %p867_p7 = scmp.ge.s32.totalorder %s1006_s24, 1  ;;  %p228_p8 = scmp.lt.s32.totalorder %s1006_s24, 3 }
   0xc   : > { %p229_p9 = pnand %p867_p7, %p228_p8 }
   0xd   : > { %p268_p10 = scmp.lt.s32.totalorder (!%p229_p9), %s1067_s25, 1  ;;  %s893_s12 = sshll.u32 (!%p229_p9), %s1067_s25, 4 }
   0xe   : > { %232 = sbr.rel (%p229_p9) target bundleno = 781 (0x30d), region = 40  ;;  %s761_s15 = scalar_lea.hbm (!%p229_p9), %s1211_s6, %s893_s12 }
   0xf   : > { %s764_s17 = sshll.u32 (!%p229_p9), %s761_s15, 4  ;;  %s964_s28 = scalar_lea.hbm (!%p229_p9), %s1211_s6, 32  ;;  %s765_s17 = int_to_ptr.hbm [resolvable:$true] %s764_s17 }
  0x13   : > { %s269_s9 = scalar_select %p268_p10, %s1067_s25, 1  ;;  %v291_v4 = vld [vmem:[%s1207_s2] sm:$0xff]  ;;  %vm300_vm0 = vcmask 261120   ;;  %v293_v11 = vld [vmem:[%s1208_s3 + $0x8] sm:$0xff]  ;;  %v294_v12 = vld [vmem:[%s1208_s3 + $0x10] sm:$0xff]  ;;  %v1008_v20 = vmov 0  }
  0x14   : > { %v292_v7 = vld [vmem:[%s1208_s3] sm:$0xff]  ;;  %v295_v19 = vld [vmem:[%s1208_s3 + $0x18] sm:$0xff]  ;;  %938 = vset.pattern.permute.xlu2 %v1008_v20  ;;  %937 = vset.pattern.permute.xlu1 %v1008_v20  ;;  %v297_v21 = vld [vmem:[%s1209_s4 + $0x8] sm:$0xff]  ;;  %vm437_vm1 = vcmask 64512   ;;  %vm621_vm2 = vcmask 130048  }
  0x15   : > { %s1096_s10 = sshll.u32 %s269_s9, 5  ;;  %351 = vperm.xlu2 %938, %v297_v21   ;;  %v298_v25 = vld [vmem:[%s1209_s4 + $0x10] sm:$0xff]  ;;  %v299_v33 = vld [vmem:[%s1209_s4 + $0x18] sm:$0xff]  ;;  %s265_s9 = sand.u32 1, %s998_s22  }
  0x16   : > { %s277_s13 = scalar_lea.vmem %s1206_s1, %s1096_s10  ;;  %s272_s18 = scalar_lea.vmem %s1205_s0, %s1096_s10 }
  0x17   : > { %v290_v0 = vld [vmem:[%s277_s13 + $0x18] sm:$0xff]  ;;  %v289_v1 = vld [vmem:[%s277_s13 + $0x10] sm:$0xff]  ;;  %v288_v2 = vld [vmem:[%s277_s13 + $0x8] sm:$0xff]  ;;  %s1161_s29 = scalar_lea.vmem %s1210_s5, %s1096_s10  ;;  %s868_s11 = sshll.u32 %s265_s9, 4 }
  0x18   : > { %336 = vmatpush.msra.mxu1 %v290_v0  ;;  %388 = vmatpush.msra.mxu2 %v290_v0  ;;  %v287_v3 = vld [vmem:[%s277_s13] sm:$0xff]  ;;  %v286_v5 = vld [vmem:[%s272_s18 + $0x18] sm:$0xff]  ;;  %v285_v6 = vld [vmem:[%s272_s18 + $0x10] sm:$0xff]  ;;  %s267_s10 = scalar_lea.vmem [#allocation2], %s868_s11  ;;  %s747_s25 = scalar_lea.sflag [#allocation3], %s265_s9 }
  0x19   : > { %316 = vmatpush.msra.mxu0 %v286_v5  ;;  %v284_v8 = vld [vmem:[%s272_s18 + $0x8] sm:$0xff]  ;;  %v283_v9 = vld [vmem:[%s272_s18] sm:$0xff]  ;;  %s762_s16 = sshll.u32 %s267_s10, 4  ;;  %s958_s18 = sshra.s32 %s765_s17, 4  ;;  %s763_s16 = int_to_ptr.vmem [resolvable:$true] %s762_s16  ;;  %s959_s18 = int_to_ptr.hbm [resolvable:$true] %s958_s18 }
  0x1a   : > { %337 = vmatpush.msra.mxu1 %v289_v1  ;;  %389 = vmatpush.msra.mxu2 %v289_v1  ;;  %s960_s19 = scalar_lea.hbm %s959_s18, 16  ;;  %p965_p0 = scmp.lt.s32.totalorder %s959_s18, %s1211_s6 }
  0x1b   : > { %317 = vmatpush.msra.mxu0 %v285_v6  ;;  %p961_p11 = scmp.ne.s32.totalorder %s959_s18, %s960_s19  ;;  %p966_p1 = scmp.lt.s32.totalorder %s964_s28, %s960_s19 }
  0x1c   : > { %338 = vmatpush.msra.mxu1 %v288_v2  ;;  %390 = vmatpush.msra.mxu2 %v288_v2  ;;  %v296_v2 = vld [vmem:[%s1209_s4] sm:$0xff] }
  0x1d   : > { %318 = vmatpush.msra.mxu0 %v284_v8  ;;  %356 = vperm.xlu2 %938, %v298_v25   ;;  %p962_p12 = pnand %p961_p11, %p1084_p5  ;;  %p967_p2 = por %p966_p1, %p965_p0 }
  0x1e   : > { %339 = vmatpush.msra.mxu1 %v287_v3  ;;  %391 = vmatpush.msra.mxu2 %v287_v3 }
  0x1f   : > { %876 = vmatmul.msk.f32.vlgmr.msra.gmra.mxu1 %vm300_vm0, %v291_v4  ;;  %877 = vmatmul.msk.f32.vlgmr.msra.gmra.mxu2 %vm300_vm0, %v292_v7  ;;  %p963_p13 = pneg %p962_p12 }
  0x20   : > { %319 = vmatpush.msra.mxu0 %v283_v9 }
  0x21   : > { %875 = vmatmul.msk.f32.vlgmr.msra.gmra.mxu0 %vm300_vm0, %v291_v4  ;;  %p968_p3 = pnand %p967_p2, %p963_p13 }
  0x25   : > { %361 = vperm.xlu2 %938, %v299_v33  }
  0x27   : > { %878 = vmatmul.msk.f32.gmra.mxu2 %vm300_vm0, %v293_v11 }
  0x2f   : > { %879 = vmatmul.msk.f32.gmra.mxu2 %vm300_vm0, %v294_v12 }
  0x37   : > { %880 = vmatmul.msk.f32.gmra.mxu2 %vm300_vm0, %v295_v19 }
  0x9c   : > { %v341_v10 = vpop.f32.mrf.mxu1 }
  0x9d   : > { %405 = vxpose.xlu0.b32.start.end [1/1] (short) (narrow) %v341_v10, 16 }
  0x9e   : > { %v321_v13 = vpop.f32.mrf.mxu0 }
  0x9f   : > { %v459_v14 = vand.u32 4294901760, %v321_v13 }
  0xa1   : > { %v494_v15 = vsub.f32 %v321_v13, %v459_v14  ;;  %460 = vmatpush.msrb.mxu2 %v459_v14  ;;  %553 = vmatpush.msra.mxu3 %v459_v14 }
  0xa2   : > { %v1136_v38 = vpop.f32.mrf.mxu2 }
  0xa3   : > { %525 = vmatpush.msrb.mxu1 %v494_v15  ;;  %v495_v16 = vand.u32 4294901760, %v494_v15 }
  0xa5   : > { %611 = vmatpush.msra.mxu1 %v459_v14  ;;  %v496_v17 = vsub.f32 %v494_v15, %v495_v16 }
  0xa7   : > { %v497_v18 = vand.u32 4294901760, %v496_v17 }
  0xa9   : > { %498 = vmatpush.msrb.mxu0 %v497_v18 }
  0xaa   : > { %v1138_v39 = vpop.f32.mrf.mxu2 }
  0xab   : > { %585 = vmatpush.msra.mxu0 %v495_v16 }
  0xb2   : > { %v1140_v40 = vpop.f32.mrf.mxu2 }
  0xba   : > { %v1142_v43 = vpop.f32.mrf.mxu2 }
 0x104   : > { %939 = vset.pattern.permute.xlu0 %v1008_v20 }
 0x141   : > { %v421_v22 = vpop.trf.xlu0 }
 0x142   : > { %v439_v23 = vsel %vm437_vm1, %v421_v22, 0 }
 0x143   : > { %v461_v24 = vand.u32 4294901760, %v439_v23 }
 0x145   : > { %v462_v26 = vsub.f32 %v439_v23, %v461_v24  ;;  %500 = vmatmul.f32.vlgmr.msrb.gmra.mxu0 %v461_v24 }
 0x147   : > { %528 = vmatmul.f32.vlgmr.msrb.gmra.mxu1 %v462_v26  ;;  %v463_v27 = vand.u32 4294901760, %v462_v26 }
 0x149   : > { %v422_v28 = vpop.trf.xlu0  ;;  %v464_v29 = vsub.f32 %v462_v26, %v463_v27  ;;  %557 = vmatmul.f32.vlgmr.msra.gmra.mxu3 %v463_v27 }
 0x14a   : > { %v442_v30 = vsel %vm437_vm1, %v422_v28, 0 }
 0x14b   : > { %v469_v31 = vand.u32 4294901760, %v442_v30  ;;  %v465_v32 = vand.u32 4294901760, %v464_v29 }
 0x14d   : > { %v470_v34 = vsub.f32 %v442_v30, %v469_v31  ;;  %466 = vmatmul.f32.vlgmr.msrb.gmra.mxu2 %v465_v32  ;;  %504 = vmatmul.f32.gmra.mxu0 %v469_v31 }
 0x14f   : > { %533 = vmatmul.f32.gmra.mxu1 %v470_v34  ;;  %v471_v35 = vand.u32 4294901760, %v470_v34 }
 0x151   : > { %563 = vmatmul.f32.gmra.mxu3 %v471_v35  ;;  %v472_v36 = vsub.f32 %v470_v34, %v471_v35 }
 0x153   : > { %v473_v37 = vand.u32 4294901760, %v472_v36 }
 0x155   : > { %474 = vmatmul.f32.gmra.mxu2 %v473_v37  ;;  %587 = vmatmul.f32.vlgmr.msra.gmra.mxu0 %v461_v24 }
 0x157   : > { %613 = vmatmul.f32.vlgmr.msra.gmra.mxu1 %v461_v24 }
 0x15d   : > { %591 = vmatmul.f32.gmra.mxu0 %v469_v31 }
 0x15f   : > { %617 = vmatmul.f32.gmra.mxu1 %v469_v31  ;;  %v352_v31 = vpop.permute.xlu2 %351 }
 0x160   : > { %v397_v32 = vadd.f32 %v1138_v39, %v352_v31 }
 0x167   : > { %v357_v33 = vpop.permute.xlu2 %356 }
 0x168   : > { %v400_v34 = vadd.f32 %v1140_v40, %v357_v33 }
 0x16f   : > { %v362_v35 = vpop.permute.xlu2 %361 }
 0x170   : > { %v403_v36 = vadd.f32 %v1142_v43, %v362_v35 }
 0x1c2   : > { %v501_v41 = vpop.f32.mrf.mxu0 }
 0x1c4   : > { %v529_v42 = vpop.f32.mrf.mxu1 }
 0x1ca   : > { %v505_v44 = vpop.f32.mrf.mxu0 }
 0x1cc   : > { %v534_v45 = vpop.f32.mrf.mxu1  ;;  %v558_v48 = vpop.f32.mrf.mxu3 }
 0x1d0   : > { %v467_v46 = vpop.f32.mrf.mxu2 }
 0x1d1   : > { %v502_v47 = vadd.f32 %v501_v41, %v467_v46 }
 0x1d2   : > { %v588_v50 = vpop.f32.mrf.mxu0 }
 0x1d3   : > { %v530_v49 = vadd.f32 %v529_v42, %v502_v47 }
 0x1d4   : > { %v614_v52 = vpop.f32.mrf.mxu1  ;;  %v564_v59 = vpop.f32.mrf.mxu3 }
 0x1d5   : > { %v559_v51 = vadd.f32 %v558_v48, %v530_v49 }
 0x1d7   : > { %v589_v53 = vadd.f32 %v588_v50, %v559_v51 }
 0x1d8   : > { %v475_v54 = vpop.f32.mrf.mxu2 }
 0x1d9   : > { %v615_v55 = vadd.f32 %v614_v52, %v589_v53  ;;  %v506_v56 = vadd.f32 %v505_v44, %v475_v54 }
 0x1da   : > { %v592_v61 = vpop.f32.mrf.mxu0 }
 0x1db   : > { %v535_v57 = vadd.f32 %v534_v45, %v506_v56  ;;  %v622_v58 = vsel %vm621_vm2, %v615_v55, 0.0 }
 0x1dc   : > { %623 = vadd.xlane.f32.xlu1 %v622_v58  ;;  %v618_v63 = vpop.f32.mrf.mxu1 }
 0x1dd   : > { %v565_v60 = vadd.f32 %v564_v59, %v535_v57 }
 0x1df   : > { %v593_v62 = vadd.f32 %v592_v61, %v565_v60 }
 0x1e1   : > { %v619_v0 = vadd.f32 %v618_v63, %v593_v62 }
 0x1e3   : > { %v625_v1 = vsel %vm621_vm2, %v619_v0, 0.0 }
 0x1e4   : > { %626 = vadd.xlane.f32.xlu0 %v625_v1 }
 0x1f5   : > { %346 = vperm.xlu1 %937, %v296_v2  }
 0x24f   : > { %v624_v3 = vpop.xlane.xlu1 %623 }
 0x250   : > { %v628_v4 = vadd.f32 1e-09, %v624_v3 }
 0x252   : > { %940 = vrcp.f32 %v628_v4  ;;  %v641_v10 = vand.u32 2147483648, %v628_v4  ;;  %v639_v12 = vand.u32 2147483647, %v628_v4  ;;  %vm635_vm4 = vweird.f32 %v628_v4 }
 0x254   : > { %v642_v15 = vor.u32 1.1754944e-38, %v641_v10  ;;  %vm640_vm6 = vcmp.eq.f32.partialorder %v639_v12, 8.507059e+37 }
 0x257   : > { %v627_v5 = vpop.xlane.xlu0 %626 }
 0x258   : > { %v941_v6 = vpop.eup %940  ;;  %v629_v7 = vadd.f32 1e-09, %v627_v5 }
 0x259   : > { %v631_v8 = vmul.f32 %v941_v6, %v628_v4  ;;  %vm636_vm3 = vweird.f32 %v941_v6 }
 0x25a   : > { %942 = vrcp.f32 %v629_v7  ;;  %vm637_vm5 = vmor %vm635_vm4, %vm636_vm3  ;;  %v656_v21 = vand.u32 2147483648, %v629_v7  ;;  %v654_v23 = vand.u32 2147483647, %v629_v7  ;;  %vm650_vm8 = vweird.f32 %v629_v7 }
 0x25b   : > { %v632_v9 = vsub.f32 1.0, %v631_v8 }
 0x25c   : > { %v657_v25 = vor.u32 1.1754944e-38, %v656_v21  ;;  %vm655_vm10 = vcmp.eq.f32.partialorder %v654_v23, 8.507059e+37 }
 0x25d   : > { %v633_v11 = vmul.f32 %v941_v6, %v632_v9 }
 0x25f   : > { %v634_v13 = vadd.f32 %v941_v6, %v633_v11 }
 0x260   : > { %v943_v14 = vpop.eup %942 }
 0x261   : > { %v646_v16 = vmul.f32 %v943_v14, %v629_v7  ;;  %v638_v17 = vsel %vm637_vm5, %v941_v6, %v634_v13  ;;  %vm651_vm7 = vweird.f32 %v943_v14 }
 0x262   : > { %v643_v18 = vsel %vm640_vm6, %v642_v15, %v638_v17  ;;  %vm652_vm9 = vmor %vm650_vm8, %vm651_vm7 }
 0x263   : > { %v647_v19 = vsub.f32 1.0, %v646_v16  ;;  %v660_v20 = vmul.f32 %v643_v18, %v615_v55 }
 0x265   : > { %v648_v22 = vmul.f32 %v943_v14, %v647_v19  ;;  %707 = vxpose.xlu2.b32.start [1/2] (short) (narrow) %v660_v20, 16 }
 0x267   : > { %v649_v24 = vadd.f32 %v943_v14, %v648_v22  ;;  %v347_v28 = vpop.permute.xlu1 %346 }
 0x268   : > { %v394_v30 = vadd.f32 %v1136_v38, %v347_v28 }
 0x269   : > { %v653_v26 = vsel %vm652_vm9, %v943_v14, %v649_v24 }
 0x26a   : > { %v658_v27 = vsel %vm655_vm10, %v657_v25, %v653_v26 }
 0x26b   : > { %v661_v29 = vmul.f32 %v658_v27, %v619_v0 }
 0x26d   : > { %708 = vxpose.xlu2.b32.end [2/2] (short) (narrow) %v661_v29, 16  ;;  %688 = vmatpush.msrb.mxu3 %v661_v29 }
 0x26f   : > { %689 = vmatpush.msrb.mxu3 %v660_v20 }
 0x270   : > { %881 = vmatmul.msk.f32.vlgmr.msrb.gmra.mxu3 %vm621_vm2, %v394_v30 }
 0x278   : > { %882 = vmatmul.msk.f32.gmra.mxu3 %vm621_vm2, %v397_v32 }
 0x280   : > { %883 = vmatmul.msk.f32.gmra.mxu3 %vm621_vm2, %v400_v34 }
 0x288   : > { %884 = vmatmul.msk.f32.gmra.mxu3 %vm621_vm2, %v403_v36 }
 0x2f3   : > { %v691_v37 = vpop.f32.mrf.mxu3 }
 0x2f4   : > { %703 = vst.msk [vmem:[%s1161_s29] sm:$0xff] %vm621_vm2, %v691_v37 }
 0x2fb   : > { %v694_v38 = vpop.f32.mrf.mxu3 }
 0x2fc   : > { %704 = vst.msk [vmem:[%s1161_s29 + $0x8] sm:$0xff] %vm621_vm2, %v694_v38 }
 0x2fe   : > { %v723_v39 = vpop.trf.xlu2 }
 0x2ff   : > { %739 = vst.msk [vmem:[%s267_s10] sm:$0xff] %vm621_vm2, %v723_v39 }
 0x303   : > { %v697_v40 = vpop.f32.mrf.mxu3 }
 0x304   : > { %705 = vst.msk [vmem:[%s1161_s29 + $0x10] sm:$0xff] %vm621_vm2, %v697_v40 }
 0x306   : > { %v724_v41 = vpop.trf.xlu2 }
 0x307   : > { %740 = vst.msk [vmem:[%s267_s10 + $0x8] sm:$0xff] %vm621_vm2, %v724_v41 }
 0x308   : > { %971 = shalt.err (!%p968_p3)
}
 0x309   : > { %s1009_s9 = smov 128   ;;  %s1010_s13 = smov 8  }
 0x30a   : > { %894 = dma.vmem_to_hbm [thread:$0]  (%p1084_p5), %s763_s16, 256, %s765_s17, %s747_s25, %s1009_s9, %s1009_s9, %s1010_s13  }
 0x30b   : > { %v700_v42 = vpop.f32.mrf.mxu3 }
 0x30c   : > { %706 = vst.msk [vmem:[%s1161_s29 + $0x18] sm:$0xff] %vm621_vm2, %v700_v42 }
 0x30d PF: > { %p900_p4 = scmp.ge.s32.totalorder %s1006_s24, 2  ;;  %s787_s14 = sand.u32 1, %s994_s21  }
 0x30e   : > { %s788_s15 = scalar_lea.sflag [#allocation3], %s787_s14 }
 0x30f   : > { %p897_p7 = pnand %p900_p4, %p1088_p6 }
 0x311   : > { %p898_p8 = pneg %p897_p7 }
 0x313   : > { %989 = dma.done.wait (%p898_p8), %s788_s15, 256  }
 0x314   : > { %991 = vsyncadd (%p898_p8), %s788_s15, 4294967040  ;;  %p17_p5 = scmp.ge.s32.totalorder %s1071_s27, 4   ;;  %s1214_s21 = smov %s998_s22 }
 0x315   : > { %s1215_s22 = smov %s1002_s23  ;;  %s1216_s23 = smov %s1082_s30 }
 0x316   : > { %s1217_s24 = smov %s1071_s27  ;;  %19 = sbr.rel (!%p17_p5) target bundleno = 3 (0x3), region = 90 }
 0x31b   :  { %794 = vsyncpa [#allocation3], 1 }
 0x31c   :  { %796 = vsyncpa [#allocation3 + $0x1], 1 }

</bundles_post_ra>
